<compile_context>
chip_gen: v6e
topology: v6e:2x2x1
jax: 0.10.0
libtpu: 0.0.40
codegen_flags: <defaults>
</compile_context>

<pallas_src>
import functools

import jax
import jax.numpy as jnp
from jax.experimental import pallas as pl
from jax.experimental.pallas import tpu as pltpu

LN_EPS = 1e-5


def _layernorm_cols(h, gamma, beta):
    """LayerNorm over the feature (sublane) axis. h: [F, TB], gamma/beta: [F, 1]."""
    mu = jnp.mean(h, axis=0, keepdims=True)
    diff = h - mu
    var = jnp.mean(diff * diff, axis=0, keepdims=True)
    return diff * jax.lax.rsqrt(var + LN_EPS) * gamma + beta


def actor_kernel(x_ref,
                 w1_ref, b1_ref, g1_ref, be1_ref,
                 w2_ref, b2_ref, g2_ref, be2_ref,
                 w3_ref, b3_ref,
                 out_ref):
    x = x_ref[...].astype(jnp.float32)                              # [D_in, TB]

    # fc1 + LayerNorm(32)
    h1 = jnp.dot(w1_ref[...], x, preferred_element_type=jnp.float32) + b1_ref[...]
    h1 = _layernorm_cols(h1, g1_ref[...], be1_ref[...])             # [32, TB]
    # NOTE: original PyTorch line `x - F.relu(x)` discards its result -> no ReLU here.

    # fc2 + LayerNorm(64) + ReLU
    h2 = jnp.dot(w2_ref[...], h1, preferred_element_type=jnp.float32) + b2_ref[...]
    h2 = jnp.maximum(_layernorm_cols(h2, g2_ref[...], be2_ref[...]), 0.0)   # [64, TB]

    # policy head + sigmoid (exp + reciprocal both on the EUP slot)
    logits = jnp.dot(w3_ref[...], h2, preferred_element_type=jnp.float32) + b3_ref[...]
    out_ref[...] = pl.reciprocal(1.0 + jnp.exp(-logits), approx=True).astype(out_ref.dtype)


def _round_up(x, m):
    return ((x + m - 1) // m) * m


@functools.partial(jax.jit, static_argnames=("tb_max",))
def actor_forward(state, params, *, tb_max=512):
    """state: [B, D_in] float32.  params: PyTorch [out, in] layout (see init_params)."""
    B, d_in = state.shape
    n_actions = params["w3"].shape[0]

    # Lane-dense layout: batch on the lane (last) axis; pad B to a 128-aligned tile.
    x_t = state.T                                                   # [D_in, B]
    TB = int(min(tb_max, _round_up(B, 128)))
    padded_B = int(_round_up(B, TB))
    if padded_B != B:
        x_t = jnp.pad(x_t, ((0, 0), (0, padded_B - B)))

    weight_args = (params["w1"], params["b1"], params["g1"], params["be1"],
                   params["w2"], params["b2"], params["g2"], params["be2"],
                   params["w3"], params["b3"])

    out_t = pl.pallas_call(
        actor_kernel,
        out_shape=jax.ShapeDtypeStruct((n_actions, padded_B), jnp.float32),
        grid=(padded_B // TB,),
        in_specs=[pl.BlockSpec((d_in, TB), lambda i: (0, i))]
                 + [pl.BlockSpec(w.shape, lambda i: (0, 0)) for w in weight_args],
        out_specs=pl.BlockSpec((n_actions, TB), lambda i: (0, i)),
        compiler_params=pltpu.CompilerParams(
            dimension_semantics=("parallel",)),
    )(x_t, *weight_args)

    return out_t[:, :B].T                                           # [B, n_actions]


def init_params(key, input_dim, n_actions):
    """Deterministic synthetic init mirroring the PyTorch module's bounds.

    PyTorch: fc1 bound = 1/sqrt(fc1.weight.size(0)) = 1/sqrt(32)
             fc2 bound = 1/sqrt(fc2.weight.size(0)) = 1/sqrt(64)
             policy bound = 0.003
    LayerNorm params default to gamma=1, beta=0.
    Weights kept in PyTorch's [out, in] layout; biases/LN params as [out, 1] columns.
    """
    k = jax.random.split(key, 6)
    f1 = 1.0 / jnp.sqrt(32.0)
    f2 = 1.0 / jnp.sqrt(64.0)
    f3 = 0.003
    return {
        "w1": jax.random.uniform(k[0], (32, input_dim), jnp.float32, -f1, f1),
        "b1": jax.random.uniform(k[1], (32, 1), jnp.float32, -f1, f1),
        "g1": jnp.ones((32, 1), jnp.float32),
        "be1": jnp.zeros((32, 1), jnp.float32),
        "w2": jax.random.uniform(k[2], (64, 32), jnp.float32, -f2, f2),
        "b2": jax.random.uniform(k[3], (64, 1), jnp.float32, -f2, f2),
        "g2": jnp.ones((64, 1), jnp.float32),
        "be2": jnp.zeros((64, 1), jnp.float32),
        "w3": jax.random.uniform(k[4], (n_actions, 64), jnp.float32, -f3, f3),
        "b3": jax.random.uniform(k[5], (n_actions, 1), jnp.float32, -f3, f3),
    }


def actor_forward_ref(state, p):
    """Pure-JAX reference (standard [B, F] layout) for correctness check."""
    def ln(h, g, b):
        mu = jnp.mean(h, axis=-1, keepdims=True)
        var = jnp.mean((h - mu) * (h - mu), axis=-1, keepdims=True)
        return (h - mu) * jax.lax.rsqrt(var + LN_EPS) * g.T + b.T
    h1 = ln(state @ p["w1"].T + p["b1"].T, p["g1"], p["be1"])
    h2 = jnp.maximum(ln(h1 @ p["w2"].T + p["b2"].T, p["g2"], p["be2"]), 0.0)
    return jax.nn.sigmoid(h2 @ p["w3"].T + p["b3"].T)


if __name__ == "__main__":
    key = jax.random.PRNGKey(0)
    kp, kx1, kx2 = jax.random.split(key, 3)

    B, D_IN, N_ACTIONS = 2, 8, 4
    params = init_params(kp, D_IN, N_ACTIONS)

    state = jax.random.normal(kx1, (B, D_IN), jnp.float32)
    out = jax.block_until_ready(actor_forward(state, params))
    ref = actor_forward_ref(state, params)
    assert out.shape == (B, N_ACTIONS)
    assert jnp.allclose(out, ref, atol=2e-3, rtol=2e-3), float(jnp.max(jnp.abs(out - ref)))

    # Exercise multiple grid steps and the batch-padding path.
    B2 = 300
    state2 = jax.random.normal(kx2, (B2, D_IN), jnp.float32)
    out2 = jax.block_until_ready(actor_forward(state2, params, tb_max=256))
    ref2 = actor_forward_ref(state2, params)
    assert out2.shape == (B2, N_ACTIONS)
    assert jnp.allclose(out2, ref2, atol=2e-3, rtol=2e-3), float(jnp.max(jnp.abs(out2 - ref2)))

    print("KERNEL_OK")
</pallas_src>

<mosaic_0001>
module attributes {stable_mosaic.version = 11 : i64} {
  func.func @actor_kernel(%arg0: i32, %arg1: memref<8x128xf32, #tpu.memory_space<vmem>>, %arg2: memref<32x8xf32, #tpu.memory_space<vmem>>, %arg3: memref<32x1xf32, #tpu.memory_space<vmem>>, %arg4: memref<32x1xf32, #tpu.memory_space<vmem>>, %arg5: memref<32x1xf32, #tpu.memory_space<vmem>>, %arg6: memref<64x32xf32, #tpu.memory_space<vmem>>, %arg7: memref<64x1xf32, #tpu.memory_space<vmem>>, %arg8: memref<64x1xf32, #tpu.memory_space<vmem>>, %arg9: memref<64x1xf32, #tpu.memory_space<vmem>>, %arg10: memref<4x64xf32, #tpu.memory_space<vmem>>, %arg11: memref<4x1xf32, #tpu.memory_space<vmem>>, %arg12: memref<4x128xf32, #tpu.memory_space<vmem>>) attributes {dimension_semantics = [#tpu.dimension_semantics<parallel>], iteration_bounds = array<i64: 1>, scalar_prefetch = 0 : i64, scratch_operands = 0 : i64, tpu.core_type = #tpu.core_type<tc>, window_params = [{transform_indices = @transform_0, window_bounds = array<i64: 8, 128>}, {pipeline_mode = #tpu.pipeline_mode<synchronous>, transform_indices = @transform_1, window_bounds = array<i64: 32, 8>}, {pipeline_mode = #tpu.pipeline_mode<synchronous>, transform_indices = @transform_2, window_bounds = array<i64: 32, 1>}, {pipeline_mode = #tpu.pipeline_mode<synchronous>, transform_indices = @transform_3, window_bounds = array<i64: 32, 1>}, {pipeline_mode = #tpu.pipeline_mode<synchronous>, transform_indices = @transform_4, window_bounds = array<i64: 32, 1>}, {pipeline_mode = #tpu.pipeline_mode<synchronous>, transform_indices = @transform_5, window_bounds = array<i64: 64, 32>}, {pipeline_mode = #tpu.pipeline_mode<synchronous>, transform_indices = @transform_6, window_bounds = array<i64: 64, 1>}, {pipeline_mode = #tpu.pipeline_mode<synchronous>, transform_indices = @transform_7, window_bounds = array<i64: 64, 1>}, {pipeline_mode = #tpu.pipeline_mode<synchronous>, transform_indices = @transform_8, window_bounds = array<i64: 64, 1>}, {pipeline_mode = #tpu.pipeline_mode<synchronous>, transform_indices = @transform_9, window_bounds = array<i64: 4, 64>}, {pipeline_mode = #tpu.pipeline_mode<synchronous>, transform_indices = @transform_10, window_bounds = array<i64: 4, 1>}, {transform_indices = @transform_11, window_bounds = array<i64: 4, 128>}]} {
    %c0 = arith.constant 0 : index
    %c0_0 = arith.constant 0 : index
    %0 = vector.load %arg1[%c0, %c0_0] : memref<8x128xf32, #tpu.memory_space<vmem>>, vector<8x128xf32>
    %c0_1 = arith.constant 0 : index
    %c0_2 = arith.constant 0 : index
    %1 = vector.load %arg2[%c0_1, %c0_2] : memref<32x8xf32, #tpu.memory_space<vmem>>, vector<32x8xf32>
    %cst = arith.constant dense<0.000000e+00> : vector<32x128xf32>
    %2 = tpu.matmul %1, %0, %cst {dimension_numbers = #tpu.dot_dimension_numbers<[1], [0], [0], [1], [0, 0, 1, 1], [], []>} : vector<32x8xf32>, vector<8x128xf32>, vector<32x128xf32> -> vector<32x128xf32>
    %c0_3 = arith.constant 0 : index
    %c0_4 = arith.constant 0 : index
    %3 = vector.load %arg3[%c0_3, %c0_4] : memref<32x1xf32, #tpu.memory_space<vmem>>, vector<32x1xf32>
    %4 = vector.broadcast %3 : vector<32x1xf32> to vector<32x128xf32>
    %5 = arith.addf %2, %4 : vector<32x128xf32>
    %c0_5 = arith.constant 0 : index
    %c0_6 = arith.constant 0 : index
    %6 = vector.load %arg4[%c0_5, %c0_6] : memref<32x1xf32, #tpu.memory_space<vmem>>, vector<32x1xf32>
    %c0_7 = arith.constant 0 : index
    %c0_8 = arith.constant 0 : index
    %7 = vector.load %arg5[%c0_7, %c0_8] : memref<32x1xf32, #tpu.memory_space<vmem>>, vector<32x1xf32>
    %cst_9 = arith.constant dense<0.000000e+00> : vector<128xf32>
    %8 = vector.multi_reduction <add>, %5, %cst_9 [0] : vector<32x128xf32> to vector<128xf32>
    %9 = vector.shape_cast %8 : vector<128xf32> to vector<1x128xf32>
    %cst_10 = arith.constant 3.200000e+01 : f32
    %10 = vector.broadcast %cst_10 : f32 to vector<1x128xf32>
    %11 = arith.divf %9, %10 : vector<1x128xf32>
    %12 = vector.broadcast %11 : vector<1x128xf32> to vector<32x128xf32>
    %13 = arith.subf %5, %12 : vector<32x128xf32>
    %14 = arith.mulf %13, %13 : vector<32x128xf32>
    %cst_11 = arith.constant dense<0.000000e+00> : vector<128xf32>
    %15 = vector.multi_reduction <add>, %14, %cst_11 [0] : vector<32x128xf32> to vector<128xf32>
    %16 = vector.shape_cast %15 : vector<128xf32> to vector<1x128xf32>
    %cst_12 = arith.constant 3.200000e+01 : f32
    %17 = vector.broadcast %cst_12 : f32 to vector<1x128xf32>
    %18 = arith.divf %16, %17 : vector<1x128xf32>
    %cst_13 = arith.constant 9.99999974E-6 : f32
    %19 = vector.broadcast %cst_13 : f32 to vector<1x128xf32>
    %20 = arith.addf %18, %19 : vector<1x128xf32>
    %21 = math.rsqrt %20 : vector<1x128xf32>
    %22 = vector.broadcast %21 : vector<1x128xf32> to vector<32x128xf32>
    %23 = arith.mulf %13, %22 : vector<32x128xf32>
    %24 = vector.broadcast %6 : vector<32x1xf32> to vector<32x128xf32>
    %25 = arith.mulf %23, %24 : vector<32x128xf32>
    %26 = vector.broadcast %7 : vector<32x1xf32> to vector<32x128xf32>
    %27 = arith.addf %25, %26 : vector<32x128xf32>
    %c0_14 = arith.constant 0 : index
    %c0_15 = arith.constant 0 : index
    %28 = vector.load %arg6[%c0_14, %c0_15] : memref<64x32xf32, #tpu.memory_space<vmem>>, vector<64x32xf32>
    %cst_16 = arith.constant dense<0.000000e+00> : vector<64x128xf32>
    %29 = tpu.matmul %28, %27, %cst_16 {dimension_numbers = #tpu.dot_dimension_numbers<[1], [0], [0], [1], [0, 0, 1, 1], [], []>} : vector<64x32xf32>, vector<32x128xf32>, vector<64x128xf32> -> vector<64x128xf32>
    %c0_17 = arith.constant 0 : index
    %c0_18 = arith.constant 0 : index
    %30 = vector.load %arg7[%c0_17, %c0_18] : memref<64x1xf32, #tpu.memory_space<vmem>>, vector<64x1xf32>
    %31 = vector.broadcast %30 : vector<64x1xf32> to vector<64x128xf32>
    %32 = arith.addf %29, %31 : vector<64x128xf32>
    %c0_19 = arith.constant 0 : index
    %c0_20 = arith.constant 0 : index
    %33 = vector.load %arg8[%c0_19, %c0_20] : memref<64x1xf32, #tpu.memory_space<vmem>>, vector<64x1xf32>
    %c0_21 = arith.constant 0 : index
    %c0_22 = arith.constant 0 : index
    %34 = vector.load %arg9[%c0_21, %c0_22] : memref<64x1xf32, #tpu.memory_space<vmem>>, vector<64x1xf32>
    %cst_23 = arith.constant dense<0.000000e+00> : vector<128xf32>
    %35 = vector.multi_reduction <add>, %32, %cst_23 [0] : vector<64x128xf32> to vector<128xf32>
    %36 = vector.shape_cast %35 : vector<128xf32> to vector<1x128xf32>
    %cst_24 = arith.constant 6.400000e+01 : f32
    %37 = vector.broadcast %cst_24 : f32 to vector<1x128xf32>
    %38 = arith.divf %36, %37 : vector<1x128xf32>
    %39 = vector.broadcast %38 : vector<1x128xf32> to vector<64x128xf32>
    %40 = arith.subf %32, %39 : vector<64x128xf32>
    %41 = arith.mulf %40, %40 : vector<64x128xf32>
    %cst_25 = arith.constant dense<0.000000e+00> : vector<128xf32>
    %42 = vector.multi_reduction <add>, %41, %cst_25 [0] : vector<64x128xf32> to vector<128xf32>
    %43 = vector.shape_cast %42 : vector<128xf32> to vector<1x128xf32>
    %cst_26 = arith.constant 6.400000e+01 : f32
    %44 = vector.broadcast %cst_26 : f32 to vector<1x128xf32>
    %45 = arith.divf %43, %44 : vector<1x128xf32>
    %cst_27 = arith.constant 9.99999974E-6 : f32
    %46 = vector.broadcast %cst_27 : f32 to vector<1x128xf32>
    %47 = arith.addf %45, %46 : vector<1x128xf32>
    %48 = math.rsqrt %47 : vector<1x128xf32>
    %49 = vector.broadcast %48 : vector<1x128xf32> to vector<64x128xf32>
    %50 = arith.mulf %40, %49 : vector<64x128xf32>
    %51 = vector.broadcast %33 : vector<64x1xf32> to vector<64x128xf32>
    %52 = arith.mulf %50, %51 : vector<64x128xf32>
    %53 = vector.broadcast %34 : vector<64x1xf32> to vector<64x128xf32>
    %54 = arith.addf %52, %53 : vector<64x128xf32>
    %cst_28 = arith.constant 0.000000e+00 : f32
    %55 = vector.broadcast %cst_28 : f32 to vector<64x128xf32>
    %56 = arith.maximumf %54, %55 : vector<64x128xf32>
    %c0_29 = arith.constant 0 : index
    %c0_30 = arith.constant 0 : index
    %57 = vector.load %arg10[%c0_29, %c0_30] : memref<4x64xf32, #tpu.memory_space<vmem>>, vector<4x64xf32>
    %cst_31 = arith.constant dense<0.000000e+00> : vector<4x128xf32>
    %58 = tpu.matmul %57, %56, %cst_31 {dimension_numbers = #tpu.dot_dimension_numbers<[1], [0], [0], [1], [0, 0, 1, 1], [], []>} : vector<4x64xf32>, vector<64x128xf32>, vector<4x128xf32> -> vector<4x128xf32>
    %c0_32 = arith.constant 0 : index
    %c0_33 = arith.constant 0 : index
    %59 = vector.load %arg11[%c0_32, %c0_33] : memref<4x1xf32, #tpu.memory_space<vmem>>, vector<4x1xf32>
    %60 = vector.broadcast %59 : vector<4x1xf32> to vector<4x128xf32>
    %61 = arith.addf %58, %60 : vector<4x128xf32>
    %cst_34 = arith.constant 0.000000e+00 : f32
    %62 = vector.broadcast %cst_34 : f32 to vector<4x128xf32>
    %63 = arith.subf %62, %61 : vector<4x128xf32>
    %64 = math.exp %63 : vector<4x128xf32>
    %cst_35 = arith.constant 1.000000e+00 : f32
    %65 = vector.broadcast %cst_35 : f32 to vector<4x128xf32>
    %66 = arith.addf %65, %64 : vector<4x128xf32>
    %67 = tpu.reciprocal %66 {approx = true} : vector<4x128xf32> -> vector<4x128xf32>
    %c0_36 = arith.constant 0 : index
    %c0_37 = arith.constant 0 : index
    %68 = vector.load %arg12[%c0_36, %c0_37] : memref<4x128xf32, #tpu.memory_space<vmem>>, vector<4x128xf32>
    tpu.vector_store %arg12[%c0_36, %c0_37], %67 {strides = array<i32>} : memref<4x128xf32, #tpu.memory_space<vmem>>, vector<4x128xf32>,
    return
  }
  func.func @transform_0(%arg0: i32) -> (i32, i32) {
    %c0_i32 = arith.constant 0 : i32
    %c0_i32_0 = arith.constant 0 : i32
    return %c0_i32, %arg0 : i32, i32
  }
  func.func @transform_1(%arg0: i32) -> (i32, i32) {
    %c0_i32 = arith.constant 0 : i32
    %c0_i32_0 = arith.constant 0 : i32
    %c0_i32_1 = arith.constant 0 : i32
    return %c0_i32, %c0_i32_0 : i32, i32
  }
  func.func @transform_2(%arg0: i32) -> (i32, i32) {
    %c0_i32 = arith.constant 0 : i32
    %c0_i32_0 = arith.constant 0 : i32
    %c0_i32_1 = arith.constant 0 : i32
    return %c0_i32, %c0_i32_0 : i32, i32
  }
  func.func @transform_3(%arg0: i32) -> (i32, i32) {
    %c0_i32 = arith.constant 0 : i32
    %c0_i32_0 = arith.constant 0 : i32
    %c0_i32_1 = arith.constant 0 : i32
    return %c0_i32, %c0_i32_0 : i32, i32
  }
  func.func @transform_4(%arg0: i32) -> (i32, i32) {
    %c0_i32 = arith.constant 0 : i32
    %c0_i32_0 = arith.constant 0 : i32
    %c0_i32_1 = arith.constant 0 : i32
    return %c0_i32, %c0_i32_0 : i32, i32
  }
  func.func @transform_5(%arg0: i32) -> (i32, i32) {
    %c0_i32 = arith.constant 0 : i32
    %c0_i32_0 = arith.constant 0 : i32
    %c0_i32_1 = arith.constant 0 : i32
    return %c0_i32, %c0_i32_0 : i32, i32
  }
  func.func @transform_6(%arg0: i32) -> (i32, i32) {
    %c0_i32 = arith.constant 0 : i32
    %c0_i32_0 = arith.constant 0 : i32
    %c0_i32_1 = arith.constant 0 : i32
    return %c0_i32, %c0_i32_0 : i32, i32
  }
  func.func @transform_7(%arg0: i32) -> (i32, i32) {
    %c0_i32 = arith.constant 0 : i32
    %c0_i32_0 = arith.constant 0 : i32
    %c0_i32_1 = arith.constant 0 : i32
    return %c0_i32, %c0_i32_0 : i32, i32
  }
  func.func @transform_8(%arg0: i32) -> (i32, i32) {
    %c0_i32 = arith.constant 0 : i32
    %c0_i32_0 = arith.constant 0 : i32
    %c0_i32_1 = arith.constant 0 : i32
    return %c0_i32, %c0_i32_0 : i32, i32
  }
  func.func @transform_9(%arg0: i32) -> (i32, i32) {
    %c0_i32 = arith.constant 0 : i32
    %c0_i32_0 = arith.constant 0 : i32
    %c0_i32_1 = arith.constant 0 : i32
    return %c0_i32, %c0_i32_0 : i32, i32
  }
  func.func @transform_10(%arg0: i32) -> (i32, i32) {
    %c0_i32 = arith.constant 0 : i32
    %c0_i32_0 = arith.constant 0 : i32
    %c0_i32_1 = arith.constant 0 : i32
    return %c0_i32, %c0_i32_0 : i32, i32
  }
  func.func @transform_11(%arg0: i32) -> (i32, i32) {
    %c0_i32 = arith.constant 0 : i32
    %c0_i32_0 = arith.constant 0 : i32
    return %c0_i32, %arg0 : i32, i32
  }
}

</mosaic_0001>

<bundles_post_ra>
// kernel: actor_forward.1
= control target key start
LH: loop header
LB: loop body
LE: loop exit
PB: predicated region body
PF: predicated region fallthrough
CT: control target
= control target key end

     0   :  { %vm67_vm0 = vcmask 64512   ;;  %v807_v0 = vmov 0   ;;  %vm312_vm1 = vcmask 261120   ;;  %vm809_vm2 = vmmov 0   ;;  %s1052_s2 = inlined_call_operand.vmem [shape: f32[32,1], index: 2, kind: input, shape index: {}]   ;;  %s1053_s0 = inlined_call_operand.vmem [shape: f32[8,128], index: 0, kind: input, shape index: {}]   ;;  %s1054_s1 = inlined_call_operand.vmem [shape: f32[32,8], index: 1, kind: input, shape index: {}]   ;;  %s1055_s3 = inlined_call_operand.vmem [shape: f32[32,1], index: 3, kind: input, shape index: {}]   ;;  %s1056_s4 = inlined_call_operand.vmem [shape: f32[32,1], index: 4, kind: input, shape index: {}]   ;;  %s1057_s6 = inlined_call_operand.vmem [shape: f32[64,1], index: 6, kind: input, shape index: {}]   ;;  %s1058_s7 = inlined_call_operand.vmem [shape: f32[64,1], index: 7, kind: input, shape index: {}]   ;;  %s1059_s8 = inlined_call_operand.vmem [shape: f32[64,1], index: 8, kind: input, shape index: {}]   ;;  %s1060_s10 = inlined_call_operand.vmem [shape: f32[4,1], index: 10, kind: input, shape index: {}]   ;;  %s1061_s5 = inlined_call_operand.vmem [shape: f32[64,32], index: 5, kind: input, shape index: {}]   ;;  %s1062_s9 = inlined_call_operand.vmem [shape: f32[4,64], index: 9, kind: input, shape index: {}]   ;;  %s1063_s11 = inlined_call_operand.vmem [shape: f32[4,128], index: 11, kind: output, shape index: {}]  }
   0x1   :  { %797 = vset.pattern.permute.xlu0 %v807_v0  ;;  %v43_v1 = vld [vmem:[%s1052_s2] sm:$0xff]  ;;  %798 = vset.pattern.permute.xlu1 %v807_v0  ;;  %v40_v4 = vld [vmem:[%s1054_s1 + $0x8] sm:$0xff]  ;;  %v41_v5 = vld [vmem:[%s1054_s1 + $0x10] sm:$0xff]  ;;  %vm624_vm3 = vcmask 523264  }
   0x2   :  { %v38_v2 = vld [vmem:[%s1053_s0] sm:$0xff]  ;;  %49 = vperm.xlu0 %797, %v43_v1   ;;  %v44_v6 = vld [vmem:[%s1052_s2 + $0x8] sm:$0xff]  ;;  %v45_v7 = vld [vmem:[%s1052_s2 + $0x10] sm:$0xff] }
   0x3   :  { %v39_v3 = vld [vmem:[%s1054_s1] sm:$0xff]  ;;  %747 = vmatprep.subr.mxu0 %v38_v2  ;;  %59 = vperm.xlu1 %798, %v45_v7   ;;  %v42_v8 = vld [vmem:[%s1054_s1 + $0x18] sm:$0xff]  ;;  %v167_v11 = vld [vmem:[%s1055_s3 + $0x10] sm:$0xff] }
   0x4   :  { %748 = vmatpush3.msra.mxu0 %v38_v2  ;;  %749 = vmatprep.mubr.msk.f32.mxu0 %vm67_vm0, %v39_v3  ;;  %v46_v9 = vld [vmem:[%s1052_s2 + $0x18] sm:$0xff]  ;;  %v166_v13 = vld [vmem:[%s1055_s3 + $0x8] sm:$0xff]  ;;  %v171_v14 = vld [vmem:[%s1056_s4 + $0x10] sm:$0xff] }
   0x5   :  { %750 = vmatmul.mubr.msk.f32.vlgmr.msra.gmra.mxu0 %vm67_vm0, %v40_v4  ;;  %v168_v10 = vld [vmem:[%s1055_s3 + $0x18] sm:$0xff]  ;;  %v165_v15 = vld [vmem:[%s1055_s3] sm:$0xff]  ;;  %v170_v16 = vld [vmem:[%s1056_s4 + $0x8] sm:$0xff] }
   0x6   :  { %752 = vmatprep.mubr.msk.f32.mxu0 %vm67_vm0, %v41_v5  ;;  %54 = vperm.xlu0 %797, %v44_v6   ;;  %v172_v12 = vld [vmem:[%s1056_s4 + $0x18] sm:$0xff]  ;;  %v169_v17 = vld [vmem:[%s1056_s4] sm:$0xff]  ;;  %v265_v19 = vld [vmem:[%s1057_s6 + $0x8] sm:$0xff] }
   0x7   :  { %64 = vperm.xlu1 %798, %v46_v9   ;;  %v264_v18 = vld [vmem:[%s1057_s6] sm:$0xff]  ;;  %v266_v20 = vld [vmem:[%s1057_s6 + $0x10] sm:$0xff]  ;;  %v267_v21 = vld [vmem:[%s1057_s6 + $0x18] sm:$0xff] }
   0x8   :  { %v268_v22 = vld [vmem:[%s1057_s6 + $0x20] sm:$0xff]  ;;  %v269_v23 = vld [vmem:[%s1057_s6 + $0x28] sm:$0xff]  ;;  %v270_v24 = vld [vmem:[%s1057_s6 + $0x30] sm:$0xff] }
   0x9   :  { %753 = vmatmul.mubr.msk.f32.gmra.mxu0 %vm67_vm0, %v42_v8  ;;  %v271_v25 = vld [vmem:[%s1057_s6 + $0x38] sm:$0xff]  ;;  %v448_v27 = vld [vmem:[%s1058_s7 + $0x30] sm:$0xff]  ;;  %v447_v29 = vld [vmem:[%s1058_s7 + $0x28] sm:$0xff] }
   0xa   :  { %225 = vperm.xlu0 %797, %v168_v10   ;;  %v449_v26 = vld [vmem:[%s1058_s7 + $0x38] sm:$0xff]  ;;  %v456_v30 = vld [vmem:[%s1059_s8 + $0x30] sm:$0xff]  ;;  %v446_v31 = vld [vmem:[%s1058_s7 + $0x20] sm:$0xff] }
   0xb   :  { %220 = vperm.xlu1 %798, %v167_v11   ;;  %v457_v28 = vld [vmem:[%s1059_s8 + $0x38] sm:$0xff]  ;;  %v455_v32 = vld [vmem:[%s1059_s8 + $0x28] sm:$0xff]  ;;  %v454_v34 = vld [vmem:[%s1059_s8 + $0x20] sm:$0xff] }
   0xc   :  { %v445_v33 = vld [vmem:[%s1058_s7 + $0x18] sm:$0xff]  ;;  %v444_v35 = vld [vmem:[%s1058_s7 + $0x10] sm:$0xff]  ;;  %v443_v37 = vld [vmem:[%s1058_s7 + $0x8] sm:$0xff] }
   0xd   :  { %v453_v36 = vld [vmem:[%s1059_s8 + $0x18] sm:$0xff]  ;;  %v452_v38 = vld [vmem:[%s1059_s8 + $0x10] sm:$0xff]  ;;  %v442_v39 = vld [vmem:[%s1058_s7] sm:$0xff] }
   0xe   :  { %249 = vperm.xlu0 %797, %v172_v12   ;;  %v451_v40 = vld [vmem:[%s1059_s8 + $0x8] sm:$0xff]  ;;  %v450_v41 = vld [vmem:[%s1059_s8] sm:$0xff] }
   0xf   :  { %215 = vperm.xlu1 %798, %v166_v13   ;;  %v618_v42 = vld [vmem:[%s1060_s10] sm:$0xf] }
  0x10   :  { %v256_v43 = vld [vmem:[%s1061_s5] sm:$0xff] }
  0x11   :  { %763 = vmatprep.mubr.msk.f32.mxu1 %vm312_vm1, %v256_v43  ;;  %v258_v43 = vld [vmem:[%s1061_s5 + $0x10] sm:$0xff] }
  0x12   :  { %244 = vperm.xlu0 %797, %v171_v14  }
  0x13   :  { %210 = vperm.xlu1 %798, %v165_v15  }
  0x16   :  { %239 = vperm.xlu0 %797, %v170_v16  }
  0x17   :  { %234 = vperm.xlu1 %798, %v169_v17  }
  0x1a   :  { %274 = vperm.xlu0 %797, %v264_v18  }
  0x1b   :  { %279 = vperm.xlu1 %798, %v265_v19  }
  0x1e   :  { %284 = vperm.xlu0 %797, %v266_v20  }
  0x1f   :  { %289 = vperm.xlu1 %798, %v267_v21  }
  0x22   :  { %294 = vperm.xlu0 %797, %v268_v22  }
  0x23   :  { %299 = vperm.xlu1 %798, %v269_v23  }
  0x26   :  { %304 = vperm.xlu0 %797, %v270_v24  }
  0x27   :  { %309 = vperm.xlu1 %798, %v271_v25  }
  0x2a   :  { %550 = vperm.xlu0 %797, %v449_v26  }
  0x2b   :  { %545 = vperm.xlu1 %798, %v448_v27  }
  0x2e   :  { %598 = vperm.xlu0 %797, %v457_v28  }
  0x2f   :  { %540 = vperm.xlu1 %798, %v447_v29  }
  0x32   :  { %593 = vperm.xlu0 %797, %v456_v30  }
  0x33   :  { %535 = vperm.xlu1 %798, %v446_v31  }
  0x36   :  { %588 = vperm.xlu0 %797, %v455_v32  }
  0x37   :  { %530 = vperm.xlu1 %798, %v445_v33  }
  0x3a   :  { %583 = vperm.xlu0 %797, %v454_v34  }
  0x3b   :  { %525 = vperm.xlu1 %798, %v444_v35  }
  0x3e   :  { %578 = vperm.xlu0 %797, %v453_v36  }
  0x3f   :  { %520 = vperm.xlu1 %798, %v443_v37  }
  0x42   :  { %573 = vperm.xlu0 %797, %v452_v38  }
  0x43   :  { %515 = vperm.xlu1 %798, %v442_v39  }
  0x46   :  { %568 = vperm.xlu0 %797, %v451_v40  }
  0x47   :  { %563 = vperm.xlu1 %798, %v450_v41  }
  0x4a   :  { %621 = vperm.xlu0 %797, %v618_v42   ;;  %v257_v42 = vld [vmem:[%s1061_s5 + $0x8] sm:$0xff] }
  0x7d   :  { %v50_v44 = vpop.permute.xlu0 %49 }
  0x7e   :  { %v60_v46 = vpop.permute.xlu1 %59 }
  0x81   :  { %v55_v49 = vpop.permute.xlu0 %54 }
  0x82   :  { %v65_v55 = vpop.permute.xlu1 %64 }
  0x85   :  { %v226_v21 = vpop.permute.xlu0 %225 }
  0x86   :  { %v221_v22 = vpop.permute.xlu1 %220 }
  0x89   :  { %v250_v23 = vpop.permute.xlu0 %249 }
  0x8a   :  { %v216_v24 = vpop.permute.xlu1 %215 }
  0x8d   :  { %v245_v29 = vpop.permute.xlu0 %244 }
  0x8e   :  { %v211_v33 = vpop.permute.xlu1 %210 }
  0x91   :  { %v240_v38 = vpop.permute.xlu0 %239 }
  0x92   :  { %v235_v40 = vpop.permute.xlu1 %234 }
  0xc5   :  { %v751_v45 = vpop.f32.mrf.mxu0 }
  0xc6   :  { %v152_v51 = vadd.f32 %v751_v45, %v55_v49  ;;  %v260_v45 = vld [vmem:[%s1061_s5 + $0x20] sm:$0xff]  ;;  %v808_v49 = vmov 0.0  }
  0xc7   :  { %v146_v47 = vpop.f32.mrf.mxu0  ;;  %775 = vmatprep.subr.mxu0 %v808_v49  ;;  %791 = vmatprep.mubr.msk.f32.mxu0 %vm809_vm2, %v808_v49 }
  0xc8   :  { %v147_v48 = vadd.f32 %v146_v47, %v50_v44  ;;  %v259_v44 = vld [vmem:[%s1061_s5 + $0x18] sm:$0xff]  ;;  %v262_v47 = vld [vmem:[%s1061_s5 + $0x30] sm:$0xff] }
  0xc9   :  { %v754_v50 = vpop.f32.mrf.mxu0 }
  0xca   :  { %v173_v53 = vadd.f32 %v152_v51, %v147_v48  ;;  %v162_v56 = vadd.f32 %v754_v50, %v65_v55  ;;  %v275_v50 = vpop.permute.xlu0 %274 }
  0xcb   :  { %v156_v52 = vpop.f32.mrf.mxu0 }
  0xcc   :  { %v157_v54 = vadd.f32 %v156_v52, %v60_v46  ;;  %v261_v46 = vld [vmem:[%s1061_s5 + $0x28] sm:$0xff] }
  0xce   :  { %v174_v57 = vadd.f32 %v173_v53, %v157_v54  ;;  %v285_v53 = vpop.permute.xlu0 %284 }
  0xd0   :  { %v175_v58 = vadd.f32 %v174_v57, %v162_v56 }
  0xd2   :  { %v176_v59 = vrot.slane %v175_v58, 4 }
  0xd4   :  { %v177_v60 = vadd.f32 %v176_v59, %v175_v58 }
  0xd6   :  { %v178_v61 = vrot.slane %v177_v60, 2 }
  0xd8   :  { %v179_v62 = vadd.f32 %v178_v61, %v177_v60 }
  0xda   :  { %v180_v63 = vrot.slane %v179_v62, 1 }
  0xdc   :  { %v181_v0 = vadd.f32 %v180_v63, %v179_v62  ;;  %v295_v62 = vpop.permute.xlu0 %294 }
  0xde   :  { %v183_v1 = vmul.f32 0.03125, %v181_v0 }
  0xe0   :  { %v184_v2 = vsub.f32 %v147_v48, %v183_v1  ;;  %v185_v3 = vsub.f32 %v152_v51, %v183_v1  ;;  %v186_v4 = vsub.f32 %v157_v54, %v183_v1  ;;  %v187_v5 = vsub.f32 %v162_v56, %v183_v1  ;;  %v263_v48 = vld [vmem:[%s1061_s5 + $0x38] sm:$0xff]  ;;  %v280_v51 = vpop.permute.xlu1 %279 }
  0xe2   :  { %v188_v6 = vmul.f32 %v184_v2, %v184_v2  ;;  %v189_v7 = vmul.f32 %v185_v3, %v185_v3  ;;  %v190_v8 = vmul.f32 %v186_v4, %v186_v4  ;;  %v191_v10 = vmul.f32 %v187_v5, %v187_v5 }
  0xe4   :  { %v192_v9 = vadd.f32 %v189_v7, %v188_v6  ;;  %v290_v56 = vpop.permute.xlu1 %289 }
  0xe6   :  { %v193_v11 = vadd.f32 %v192_v9, %v190_v8  ;;  %v305_v9 = vpop.permute.xlu0 %304 }
  0xe8   :  { %v194_v12 = vadd.f32 %v193_v11, %v191_v10 }
  0xea   :  { %v195_v13 = vrot.slane %v194_v12, 4 }
  0xec   :  { %v196_v14 = vadd.f32 %v195_v13, %v194_v12 }
  0xee   :  { %v197_v15 = vrot.slane %v196_v14, 2 }
  0xf0   :  { %v198_v16 = vadd.f32 %v197_v15, %v196_v14 }
  0xf2   :  { %v199_v17 = vrot.slane %v198_v16, 1 }
  0xf4   :  { %v200_v18 = vadd.f32 %v199_v17, %v198_v16 }
  0xf6   :  { %v201_v19 = vmul.f32 0.03125, %v200_v18 }
  0xf8   :  { %v202_v20 = vadd.f32 1e-05, %v201_v19 }
  0xfa   :  { %799 = vrsqrt.f32 %v202_v20 }
 0x107   :  { %v800_v25 = vpop.eup %799 }
 0x108   :  { %v206_v26 = vmul.f32 %v800_v25, %v186_v4  ;;  %v207_v27 = vmul.f32 %v800_v25, %v187_v5  ;;  %v205_v28 = vmul.f32 %v800_v25, %v185_v3  ;;  %v204_v32 = vmul.f32 %v800_v25, %v184_v2  ;;  %v300_v2 = vpop.permute.xlu1 %299 }
 0x10a   :  { %v231_v30 = vmul.f32 %v226_v21, %v207_v27  ;;  %v230_v31 = vmul.f32 %v221_v22, %v206_v26  ;;  %v229_v35 = vmul.f32 %v216_v24, %v205_v28  ;;  %v228_v37 = vmul.f32 %v211_v33, %v204_v32 }
 0x10c   :  { %v255_v34 = vadd.f32 %v250_v23, %v231_v30  ;;  %v254_v36 = vadd.f32 %v245_v29, %v230_v31  ;;  %v253_v39 = vadd.f32 %v240_v38, %v229_v35  ;;  %v252_v41 = vadd.f32 %v235_v40, %v228_v37  ;;  %v310_v13 = vpop.permute.xlu1 %309 }
 0x10e   :  { %755 = vmatprep.subr.mxu1 %v255_v34 }
 0x10f   :  { %756 = vmatpush3.msra.mxu1 %v255_v34 }
 0x110   :  { %757 = vmatprep.subr.mxu1 %v254_v36 }
 0x111   :  { %758 = vmatpush3.msra.mxu1 %v254_v36 }
 0x112   :  { %759 = vmatprep.subr.mxu1 %v253_v39 }
 0x113   :  { %760 = vmatpush3.msra.mxu1 %v253_v39 }
 0x114   :  { %761 = vmatprep.subr.mxu1 %v252_v41 }
 0x115   :  { %762 = vmatpush3.msra.mxu1 %v252_v41 }
 0x116   :  { %764 = vmatmul.mubr.msk.f32.vlgmr.msra.gmra.mxu1 %vm312_vm1, %v257_v42 }
 0x117   :  { %766 = vmatprep.mubr.msk.f32.mxu1 %vm312_vm1, %v258_v43 }
 0x11a   :  { %767 = vmatmul.mubr.msk.f32.gmra.mxu1 %vm312_vm1, %v259_v44 }
 0x11b   :  { %769 = vmatprep.mubr.msk.f32.mxu1 %vm312_vm1, %v260_v45 }
 0x11e   :  { %770 = vmatmul.mubr.msk.f32.gmra.mxu1 %vm312_vm1, %v261_v46 }
 0x11f   :  { %772 = vmatprep.mubr.msk.f32.mxu1 %vm312_vm1, %v262_v47 }
 0x122   :  { %773 = vmatmul.mubr.msk.f32.gmra.mxu1 %vm312_vm1, %v263_v48  ;;  %v551_v48 = vpop.permute.xlu0 %550 }
 0x1d6   :  { %v765_v52 = vpop.f32.mrf.mxu1 }
 0x1d7   :  { %v409_v58 = vadd.f32 %v765_v52, %v280_v51  ;;  %v546_v51 = vpop.permute.xlu1 %545 }
 0x1d8   :  { %v403_v54 = vpop.f32.mrf.mxu1 }
 0x1d9   :  { %v404_v55 = vadd.f32 %v403_v54, %v275_v50  ;;  %v599_v54 = vpop.permute.xlu0 %598 }
 0x1da   :  { %v768_v57 = vpop.f32.mrf.mxu1 }
 0x1db   :  { %v458_v60 = vadd.f32 %v409_v58, %v404_v55  ;;  %v419_v0 = vadd.f32 %v768_v57, %v290_v56  ;;  %v541_v56 = vpop.permute.xlu1 %540 }
 0x1dc   :  { %v413_v59 = vpop.f32.mrf.mxu1 }
 0x1dd   :  { %v414_v61 = vadd.f32 %v413_v59, %v285_v53  ;;  %v594_v59 = vpop.permute.xlu0 %593 }
 0x1de   :  { %v771_v63 = vpop.f32.mrf.mxu1 }
 0x1df   :  { %v459_v1 = vadd.f32 %v458_v60, %v414_v61  ;;  %v429_v7 = vadd.f32 %v771_v63, %v300_v2 }
 0x1e0   :  { %v423_v3 = vpop.f32.mrf.mxu1 }
 0x1e1   :  { %v424_v4 = vadd.f32 %v423_v3, %v295_v62  ;;  %v460_v5 = vadd.f32 %v459_v1, %v419_v0  ;;  %v589_v62 = vpop.permute.xlu0 %588 }
 0x1e2   :  { %v774_v6 = vpop.f32.mrf.mxu1 }
 0x1e3   :  { %v461_v8 = vadd.f32 %v460_v5, %v424_v4  ;;  %v439_v14 = vadd.f32 %v774_v6, %v310_v13 }
 0x1e4   :  { %v433_v10 = vpop.f32.mrf.mxu1 }
 0x1e5   :  { %v434_v11 = vadd.f32 %v433_v10, %v305_v9  ;;  %v462_v12 = vadd.f32 %v461_v8, %v429_v7 }
 0x1e7   :  { %v463_v15 = vadd.f32 %v462_v12, %v434_v11 }
 0x1e9   :  { %v464_v16 = vadd.f32 %v463_v15, %v439_v14 }
 0x1eb   :  { %v465_v17 = vrot.slane %v464_v16, 4 }
 0x1ed   :  { %v466_v18 = vadd.f32 %v465_v17, %v464_v16 }
 0x1ef   :  { %v467_v19 = vrot.slane %v466_v18, 2 }
 0x1f1   :  { %v468_v20 = vadd.f32 %v467_v19, %v466_v18 }
 0x1f3   :  { %v469_v21 = vrot.slane %v468_v20, 1 }
 0x1f5   :  { %v470_v22 = vadd.f32 %v469_v21, %v468_v20 }
 0x1f7   :  { %v472_v23 = vmul.f32 0.015625, %v470_v22 }
 0x1f9   :  { %v1034_v24 = vsub.f32 %v404_v55, %v472_v23  ;;  %v474_v25 = vsub.f32 %v409_v58, %v472_v23  ;;  %v475_v26 = vsub.f32 %v414_v61, %v472_v23  ;;  %v476_v27 = vsub.f32 %v419_v0, %v472_v23  ;;  %v536_v61 = vpop.permute.xlu1 %535  ;;  %v584_v0 = vpop.permute.xlu0 %583 }
 0x1fa   :  { %v477_v30 = vsub.f32 %v424_v4, %v472_v23  ;;  %v478_v33 = vsub.f32 %v429_v7, %v472_v23  ;;  %v479_v36 = vsub.f32 %v434_v11, %v472_v23  ;;  %v480_v39 = vsub.f32 %v439_v14, %v472_v23 }
 0x1fb   :  { %v481_v28 = vmul.f32 %v1034_v24, %v1034_v24  ;;  %v482_v29 = vmul.f32 %v474_v25, %v474_v25  ;;  %v483_v31 = vmul.f32 %v475_v26, %v475_v26  ;;  %v484_v34 = vmul.f32 %v476_v27, %v476_v27 }
 0x1fc   :  { %v485_v37 = vmul.f32 %v477_v30, %v477_v30  ;;  %v486_v40 = vmul.f32 %v478_v33, %v478_v33  ;;  %v487_v42 = vmul.f32 %v479_v36, %v479_v36  ;;  %v488_v44 = vmul.f32 %v480_v39, %v480_v39 }
 0x1fd   :  { %v489_v32 = vadd.f32 %v482_v29, %v481_v28  ;;  %v531_v63 = vpop.permute.xlu1 %530  ;;  %v579_v7 = vpop.permute.xlu0 %578 }
 0x1ff   :  { %v490_v35 = vadd.f32 %v489_v32, %v483_v31 }
 0x201   :  { %v491_v38 = vadd.f32 %v490_v35, %v484_v34  ;;  %v526_v1 = vpop.permute.xlu1 %525  ;;  %v574_v21 = vpop.permute.xlu0 %573 }
 0x203   :  { %v492_v41 = vadd.f32 %v491_v38, %v485_v37 }
 0x205   :  { %v493_v43 = vadd.f32 %v492_v41, %v486_v40  ;;  %v521_v12 = vpop.permute.xlu1 %520  ;;  %v569_v34 = vpop.permute.xlu0 %568  ;;  %v617_v41 = vld [vmem:[%s1062_s9] sm:$0xf] }
 0x207   :  { %v494_v45 = vadd.f32 %v493_v43, %v487_v42 }
 0x209   :  { %v495_v46 = vadd.f32 %v494_v45, %v488_v44  ;;  %v622_v42 = vpop.permute.xlu0 %621 }
 0x20b   :  { %v496_v47 = vrot.slane %v495_v46, 4 }
 0x20d   :  { %v497_v50 = vadd.f32 %v496_v47, %v495_v46 }
 0x20f   :  { %v498_v52 = vrot.slane %v497_v50, 2 }
 0x211   :  { %v499_v53 = vadd.f32 %v498_v52, %v497_v50 }
 0x213   :  { %v500_v55 = vrot.slane %v499_v53, 1 }
 0x215   :  { %v501_v57 = vadd.f32 %v500_v55, %v499_v53 }
 0x217   :  { %v502_v58 = vmul.f32 0.015625, %v501_v57 }
 0x219   :  { %v503_v60 = vadd.f32 1e-05, %v502_v58 }
 0x21b   :  { %801 = vrsqrt.f32 %v503_v60 }
 0x228   :  { %v802_v2 = vpop.eup %801 }
 0x229   :  { %v511_v3 = vmul.f32 %v802_v2, %v479_v36  ;;  %v512_v4 = vmul.f32 %v802_v2, %v480_v39  ;;  %v510_v5 = vmul.f32 %v802_v2, %v478_v33  ;;  %v509_v6 = vmul.f32 %v802_v2, %v477_v30  ;;  %v516_v30 = vpop.permute.xlu1 %515 }
 0x22a   :  { %v508_v11 = vmul.f32 %v802_v2, %v476_v27  ;;  %v507_v16 = vmul.f32 %v802_v2, %v475_v26  ;;  %v506_v20 = vmul.f32 %v802_v2, %v474_v25  ;;  %v505_v29 = vmul.f32 %v802_v2, %v1034_v24 }
 0x22b   :  { %v559_v8 = vmul.f32 %v546_v51, %v511_v3  ;;  %v560_v9 = vmul.f32 %v551_v48, %v512_v4  ;;  %v558_v10 = vmul.f32 %v541_v56, %v510_v5  ;;  %v557_v15 = vmul.f32 %v536_v61, %v509_v6 }
 0x22c   :  { %v556_v19 = vmul.f32 %v531_v63, %v508_v11  ;;  %v555_v28 = vmul.f32 %v526_v1, %v507_v16  ;;  %v554_v32 = vmul.f32 %v521_v12, %v506_v20  ;;  %v553_v25 = vmul.f32 %v516_v30, %v505_v29 }
 0x22d   :  { %v608_v13 = vadd.f32 %v599_v54, %v560_v9  ;;  %v607_v14 = vadd.f32 %v594_v59, %v559_v8  ;;  %v606_v18 = vadd.f32 %v589_v62, %v558_v10  ;;  %v605_v23 = vadd.f32 %v584_v0, %v557_v15  ;;  %v564_v24 = vpop.permute.xlu1 %563 }
 0x22e   :  { %v604_v31 = vadd.f32 %v579_v7, %v556_v19  ;;  %v603_v33 = vadd.f32 %v574_v21, %v555_v28  ;;  %v602_v36 = vadd.f32 %v569_v34, %v554_v32  ;;  %v601_v38 = vadd.f32 %v564_v24, %v553_v25 }
 0x22f   :  { %v616_v17 = vmax.f32 %v608_v13, 0.0  ;;  %v615_v22 = vmax.f32 %v607_v14, 0.0  ;;  %v614_v27 = vmax.f32 %v606_v18, 0.0  ;;  %v613_v26 = vmax.f32 %v605_v23, 0.0 }
 0x230   :  { %v612_v35 = vmax.f32 %v604_v31, 0.0  ;;  %v611_v37 = vmax.f32 %v603_v33, 0.0  ;;  %v610_v39 = vmax.f32 %v602_v36, 0.0  ;;  %v609_v40 = vmax.f32 %v601_v38, 0.0 }
 0x231   :  { %776 = vmatpush3.msra.mxu0 %v616_v17 }
 0x232   :  { %777 = vmatprep.subr.mxu0 %v808_v49 }
 0x233   :  { %778 = vmatpush3.msra.mxu0 %v615_v22 }
 0x234   :  { %779 = vmatprep.subr.mxu0 %v808_v49 }
 0x235   :  { %780 = vmatpush3.msra.mxu0 %v614_v27 }
 0x236   :  { %781 = vmatprep.subr.mxu0 %v808_v49 }
 0x237   :  { %782 = vmatpush3.msra.mxu0 %v613_v26 }
 0x238   :  { %783 = vmatprep.subr.mxu0 %v808_v49 }
 0x239   :  { %784 = vmatpush3.msra.mxu0 %v612_v35 }
 0x23a   :  { %785 = vmatprep.subr.mxu0 %v808_v49 }
 0x23b   :  { %786 = vmatpush3.msra.mxu0 %v611_v37 }
 0x23c   :  { %787 = vmatprep.subr.mxu0 %v808_v49 }
 0x23d   :  { %788 = vmatpush3.msra.mxu0 %v610_v39 }
 0x23e   :  { %789 = vmatprep.subr.mxu0 %v808_v49 }
 0x23f   :  { %790 = vmatpush3.msra.mxu0 %v609_v40 }
 0x240   :  { %792 = vmatmul.mubr.msk.f32.vlgmr.msra.gmra.mxu0 %vm624_vm3, %v617_v41 }
 0x300   :  { %v694_v43 = vpop.f32.mrf.mxu0 }
 0x301   :  { %v695_v44 = vadd.f32 %v694_v43, %v622_v42 }
 0x302   :  { %v793_v45 = vpop.f32.mrf.mxu0 }
 0x303   :  { %v698_v46 = vsub.f32 0.0, %v695_v44 }
 0x305   :  { %v699_v47 = vmul.f32 1.442695, %v698_v46 }
 0x307   :  { %803 = vpow2.f32 %v699_v47 }
 0x314   :  { %v804_v48 = vpop.eup %803 }
 0x315   :  { %v701_v50 = vadd.f32 1.0, %v804_v48 }
 0x317   :  { %805 = vrcp.f32 %v701_v50 }
 0x324   :  { %v806_v51 = vpop.eup %805 }
 0x325   :  { %703 = vst [vmem:[%s1063_s11] sm:$0xf] %v806_v51 }

</bundles_post_ra>
